<compile_context>
chip_gen: v7x
topology: tpu7x:2x2x1
jax: 0.10.0
libtpu: 0.0.40
codegen_flags: <defaults>
</compile_context>

<pallas_src>
import functools
import math

import jax
import jax.numpy as jnp
from jax.experimental import pallas as pl
from jax.experimental.pallas import tpu as pltpu


def _round_up(x: int, m: int) -> int:
    return ((x + m - 1) // m) * m


def _nbytes(shape, dtype) -> int:
    return math.prod(shape) * jnp.dtype(dtype).itemsize


# ----------------------------------------------------------------------------
# Kernel A: weights resident in VMEM (fetched once), sliced per d_ff tile.
# ----------------------------------------------------------------------------
def _ffn_kernel_resident(x_ref, w1_ref, b1_ref, w2_ref, b2_ref, o_ref, acc_ref, *, tf):
    f = pl.program_id(1)

    @pl.when(f == 0)
    def _():
        acc_ref[...] = jnp.zeros_like(acc_ref)

    off = pl.multiple_of(f * tf, 128)
    w1 = w1_ref[:, pl.ds(off, tf)]          # (d_model, tf)  bf16
    b1 = b1_ref[:, pl.ds(off, tf)]          # (1, tf)        f32
    w2 = w2_ref[pl.ds(off, tf), :]          # (tf, d_model)  bf16

    h = jnp.dot(x_ref[...], w1, preferred_element_type=jnp.float32)
    h = jnp.maximum(h + b1, 0.0)
    # TODO(synk): dropout on `h` omitted (inference-mode identity).
    acc_ref[...] += jnp.dot(
        h.astype(w2_ref.dtype), w2, preferred_element_type=jnp.float32
    )

    @pl.when(f == pl.num_programs(1) - 1)
    def _():
        o_ref[...] = (acc_ref[...] + b2_ref[...]).astype(o_ref.dtype)


# ----------------------------------------------------------------------------
# Kernel B: weights streamed as slabs per d_ff tile (only when they don't fit).
# ----------------------------------------------------------------------------
def _ffn_kernel_streamed(x_ref, w1_ref, b1_ref, w2_ref, b2_ref, o_ref, acc_ref):
    f = pl.program_id(1)

    @pl.when(f == 0)
    def _():
        acc_ref[...] = jnp.zeros_like(acc_ref)

    h = jnp.dot(x_ref[...], w1_ref[...], preferred_element_type=jnp.float32)
    h = jnp.maximum(h + b1_ref[...], 0.0)
    # TODO(synk): dropout on `h` omitted (inference-mode identity).
    acc_ref[...] += jnp.dot(
        h.astype(w2_ref.dtype), w2_ref[...], preferred_element_type=jnp.float32
    )

    @pl.when(f == pl.num_programs(1) - 1)
    def _():
        o_ref[...] = (acc_ref[...] + b2_ref[...]).astype(o_ref.dtype)


def _pick_tf(d_ff: int, desired: int = 512) -> int:
    """Largest lane-aligned (128) divisor of d_ff <= desired; else full d_ff."""
    if d_ff <= desired:
        return d_ff
    t = (desired // 128) * 128
    while t >= 128:
        if d_ff % t == 0:
            return t
        t -= 128
    # Realistic transformer d_ff is a multiple of 128; fall back to one step.
    return d_ff


def feed_forward(x2d, w1, b1, w2, b2, *, out_dtype=None):
    """x2d: (N, d_model) [bf16]; w1: (d_model, d_ff) bf16; b1: (1, d_ff) f32;
    w2: (d_ff, d_model) bf16; b2: (1, d_model) f32."""
    n, d_model = x2d.shape
    d_ff = w1.shape[1]
    out_dtype = out_dtype or x2d.dtype

    # --- decide whether weights can stay VMEM-resident for the whole kernel ---
    w_bytes = _nbytes(w1.shape, w1.dtype) + _nbytes(w2.shape, w2.dtype)
    resident = w_bytes <= 20 * 1024 * 1024

    # --- tiles (MXU/lane aligned); pad N rather than accepting oddball tiles ---
    sub_min = 16 if x2d.dtype == jnp.bfloat16 else 8
    tm_desired = 256 if resident else 512
    if n <= tm_desired:
        align = 128 if n >= 128 else sub_min
        tm = max(sub_min, _round_up(n, align))
    else:
        tm = tm_desired
    n_pad = _round_up(n, tm)
    if n_pad != n:
        x2d = jnp.pad(x2d, ((0, n_pad - n), (0, 0)))

    tf = _pick_tf(d_ff)
    grid = (n_pad // tm, d_ff // tf)

    # --- specs ---
    x_spec = pl.BlockSpec((tm, d_model), lambda i, f: (i, 0))
    out_spec = pl.BlockSpec((tm, d_model), lambda i, f: (i, 0))
    b2_spec = pl.BlockSpec((1, d_model), lambda i, f: (0, 0))

    if resident:
        kernel = functools.partial(_ffn_kernel_resident, tf=tf)
        w1_spec = pl.BlockSpec((d_model, d_ff), lambda i, f: (0, 0))  # fetched once
        b1_spec = pl.BlockSpec((1, d_ff), lambda i, f: (0, 0))
        w2_spec = pl.BlockSpec((d_ff, d_model), lambda i, f: (0, 0))  # fetched once
        w1_blk, b1_blk, w2_blk = (d_model, d_ff), (1, d_ff), (d_ff, d_model)
    else:
        kernel = _ffn_kernel_streamed
        w1_spec = pl.BlockSpec((d_model, tf), lambda i, f: (0, f))
        b1_spec = pl.BlockSpec((1, tf), lambda i, f: (0, f))
        w2_spec = pl.BlockSpec((tf, d_model), lambda i, f: (f, 0))
        w1_blk, b1_blk, w2_blk = (d_model, tf), (1, tf), (tf, d_model)

    # --- explicit VMEM budget (2x in/out blocks for double-buffering + f32 acc) ---
    block_bytes = 2 * (
        _nbytes((tm, d_model), x2d.dtype)
        + _nbytes(w1_blk, w1.dtype)
        + _nbytes(b1_blk, b1.dtype)
        + _nbytes(w2_blk, w2.dtype)
        + _nbytes((1, d_model), b2.dtype)
        + _nbytes((tm, d_model), out_dtype)
    ) + _nbytes((tm, d_model), jnp.float32)
    vmem_limit = min(64 * 1024 * 1024, max(16 * 1024 * 1024, int(block_bytes * 1.3)))

    # --- advisory cost estimate (weight traffic depends on residency) ---
    weight_passes = 1 if resident else (n_pad // tm)
    bytes_accessed = (
        _nbytes(x2d.shape, x2d.dtype)
        + _nbytes((n_pad, d_model), out_dtype)
        + weight_passes * (w_bytes + _nbytes(b1.shape, b1.dtype))
        + _nbytes(b2.shape, b2.dtype)
    )
    cost = pl.CostEstimate(
        flops=4 * n_pad * d_model * d_ff,
        transcendentals=0,
        bytes_accessed=bytes_accessed,
    )

    y = pl.pallas_call(
        kernel,
        out_shape=jax.ShapeDtypeStruct((n_pad, d_model), out_dtype),
        grid_spec=pltpu.PrefetchScalarGridSpec(
            num_scalar_prefetch=0,
            grid=grid,
            in_specs=[x_spec, w1_spec, b1_spec, w2_spec, b2_spec],
            out_specs=out_spec,
            scratch_shapes=[pltpu.VMEM((tm, d_model), jnp.float32)],
        ),
        compiler_params=pltpu.CompilerParams(
            dimension_semantics=("parallel", "arbitrary"),
            vmem_limit_bytes=vmem_limit,
        ),
        cost_estimate=cost,
    )(x2d, w1, b1, w2, b2)

    return y[:n] if n_pad != n else y


# ----------------------------------------------------------------------------
# Module wrapper
# ----------------------------------------------------------------------------
class FeedForwardBlock:
    def __init__(self, d_model: int, d_ff: int, dropout: float, key,
                 param_dtype=jnp.bfloat16):
        self.d_model = d_model
        self.d_ff = d_ff
        self.dropout = dropout  # identity at inference; TODO(synk): training dropout

        k1, k2, k3, k4 = jax.random.split(key, 4)
        b1_bound = 1.0 / math.sqrt(d_model)
        b2_bound = 1.0 / math.sqrt(d_ff)
        # Weights pre-transposed (d_in, d_out) and stored bf16 (MXU native);
        # biases kept f32 for the f32 epilogue.
        self.w1 = jax.random.uniform(k1, (d_model, d_ff), jnp.float32,
                                     -b1_bound, b1_bound).astype(param_dtype)
        self.b1 = jax.random.uniform(k2, (1, d_ff), jnp.float32, -b1_bound, b1_bound)
        self.w2 = jax.random.uniform(k3, (d_ff, d_model), jnp.float32,
                                     -b2_bound, b2_bound).astype(param_dtype)
        self.b2 = jax.random.uniform(k4, (1, d_model), jnp.float32, -b2_bound, b2_bound)

    def __call__(self, x):
        *lead, d_model = x.shape
        assert d_model == self.d_model
        n = math.prod(lead)
        x2d = x.reshape(n, d_model).astype(self.w1.dtype)  # bf16 MXU inputs
        y = feed_forward(x2d, self.w1, self.b1, self.w2, self.b2, out_dtype=x.dtype)
        return y.reshape(*lead, d_model)


# ----------------------------------------------------------------------------
# Pure-JAX reference (same bf16 weights, f32 accumulation) for correctness check
# ----------------------------------------------------------------------------
def _reference(ffn, x):
    xb = x.astype(ffn.w1.dtype)
    h = jnp.dot(xb, ffn.w1, preferred_element_type=jnp.float32) + ffn.b1
    h = jnp.maximum(h, 0.0)
    y = jnp.dot(h.astype(ffn.w2.dtype), ffn.w2,
                preferred_element_type=jnp.float32) + ffn.b2
    return y.astype(x.dtype)


if __name__ == "__main__":
    B, S, D, DFF = 2, 8, 128, 512  # batch, seq, d_model, d_ff

    root = jax.random.PRNGKey(0)
    k_params, k_x = jax.random.split(root)

    ffn = FeedForwardBlock(d_model=D, d_ff=DFF, dropout=0.0, key=k_params)
    x = jax.random.normal(k_x, (B, S, D), jnp.float32)

    out = jax.block_until_ready(ffn(x))

    ref = _reference(ffn, x)
    assert out.shape == (B, S, D)
    assert jnp.allclose(out, ref, atol=1e-2, rtol=1e-2), float(
        jnp.max(jnp.abs(out - ref))
    )

    print("KERNEL_OK")
</pallas_src>

<mosaic_0001>
module attributes {stable_mosaic.version = 11 : i64} {
  func.func @_ffn_kernel_resident(%arg0: i32, %arg1: i32, %arg2: memref<16x128xbf16, #tpu.memory_space<vmem>>, %arg3: memref<128x512xbf16, #tpu.memory_space<vmem>>, %arg4: memref<1x512xf32, #tpu.memory_space<vmem>>, %arg5: memref<512x128xbf16, #tpu.memory_space<vmem>>, %arg6: memref<1x128xf32, #tpu.memory_space<vmem>>, %arg7: memref<16x128xf32, #tpu.memory_space<vmem>>, %arg8: memref<16x128xf32, #tpu.memory_space<vmem>>) attributes {dimension_semantics = [#tpu.dimension_semantics<parallel>, #tpu.dimension_semantics<arbitrary>], iteration_bounds = array<i64: 1, 1>, scalar_prefetch = 0 : i64, scratch_operands = 1 : i64, tpu.core_type = #tpu.core_type<tc>, window_params = [{transform_indices = @transform_0, window_bounds = array<i64: 16, 128>}, {pipeline_mode = #tpu.pipeline_mode<synchronous>, transform_indices = @transform_1, window_bounds = array<i64: 128, 512>}, {pipeline_mode = #tpu.pipeline_mode<synchronous>, transform_indices = @transform_2, window_bounds = array<i64: 1, 512>}, {pipeline_mode = #tpu.pipeline_mode<synchronous>, transform_indices = @transform_3, window_bounds = array<i64: 512, 128>}, {pipeline_mode = #tpu.pipeline_mode<synchronous>, transform_indices = @transform_4, window_bounds = array<i64: 1, 128>}, {transform_indices = @transform_5, window_bounds = array<i64: 16, 128>}]} {
    %c0_i32 = arith.constant 0 : i32
    %0 = arith.cmpi eq, %arg1, %c0_i32 : i32
    %1 = arith.extui %0 : i1 to i32
    %c0_i32_0 = arith.constant 0 : i32
    %2 = arith.cmpi ne, %1, %c0_i32_0 : i32
    scf.if %2 {
      %cst_13 = arith.constant 0.000000e+00 : f32
      %25 = vector.broadcast %cst_13 : f32 to vector<16x128xf32>
      %c0_14 = arith.constant 0 : index
      %c0_15 = arith.constant 0 : index
      %26 = vector.load %arg8[%c0_14, %c0_15] : memref<16x128xf32, #tpu.memory_space<vmem>>, vector<16x128xf32>
      tpu.vector_store %arg8[%c0_14, %c0_15], %25 {strides = array<i32>} : memref<16x128xf32, #tpu.memory_space<vmem>>, vector<16x128xf32>,
    } else {
    }
    %c512_i32 = arith.constant 512 : i32
    %3 = arith.muli %arg1, %c512_i32 : i32
    %4 = tpu.assume_multiple %3, 128 : i32
    %c0 = arith.constant 0 : index
    %5 = arith.index_cast %4 : i32 to index
    %6 = vector.load %arg3[%c0, %5] : memref<128x512xbf16, #tpu.memory_space<vmem>>, vector<128x512xbf16>
    %c0_1 = arith.constant 0 : index
    %7 = arith.index_cast %4 : i32 to index
    %8 = vector.load %arg4[%c0_1, %7] : memref<1x512xf32, #tpu.memory_space<vmem>>, vector<1x512xf32>
    %9 = arith.index_cast %4 : i32 to index
    %c0_2 = arith.constant 0 : index
    %10 = vector.load %arg5[%9, %c0_2] : memref<512x128xbf16, #tpu.memory_space<vmem>>, vector<512x128xbf16>
    %c0_3 = arith.constant 0 : index
    %c0_4 = arith.constant 0 : index
    %11 = vector.load %arg2[%c0_3, %c0_4] : memref<16x128xbf16, #tpu.memory_space<vmem>>, vector<16x128xbf16>
    %cst = arith.constant dense<0.000000e+00> : vector<16x512xf32>
    %12 = tpu.matmul %11, %6, %cst {dimension_numbers = #tpu.dot_dimension_numbers<[1], [0], [0], [1], [0, 0, 1, 1], [], []>} : vector<16x128xbf16>, vector<128x512xbf16>, vector<16x512xf32> -> vector<16x512xf32>
    %13 = vector.broadcast %8 : vector<1x512xf32> to vector<16x512xf32>
    %14 = arith.addf %12, %13 : vector<16x512xf32>
    %cst_5 = arith.constant 0.000000e+00 : f32
    %15 = vector.broadcast %cst_5 : f32 to vector<16x512xf32>
    %16 = arith.maximumf %14, %15 : vector<16x512xf32>
    %c0_6 = arith.constant 0 : index
    %c0_7 = arith.constant 0 : index
    %17 = vector.load %arg8[%c0_6, %c0_7] : memref<16x128xf32, #tpu.memory_space<vmem>>, vector<16x128xf32>
    %18 = arith.truncf %16 : vector<16x512xf32> to vector<16x512xbf16>
    %cst_8 = arith.constant dense<0.000000e+00> : vector<16x128xf32>
    %19 = tpu.matmul %18, %10, %cst_8 {dimension_numbers = #tpu.dot_dimension_numbers<[1], [0], [0], [1], [0, 0, 1, 1], [], []>} : vector<16x512xbf16>, vector<512x128xbf16>, vector<16x128xf32> -> vector<16x128xf32>
    %20 = arith.addf %17, %19 : vector<16x128xf32>
    %c0_9 = arith.constant 0 : index
    %c0_10 = arith.constant 0 : index
    %21 = vector.load %arg8[%c0_9, %c0_10] : memref<16x128xf32, #tpu.memory_space<vmem>>, vector<16x128xf32>
    tpu.vector_store %arg8[%c0_9, %c0_10], %20 {strides = array<i32>} : memref<16x128xf32, #tpu.memory_space<vmem>>, vector<16x128xf32>,
    %c0_i32_11 = arith.constant 0 : i32
    %22 = arith.cmpi eq, %arg1, %c0_i32_11 : i32
    %23 = arith.extui %22 : i1 to i32
    %c0_i32_12 = arith.constant 0 : i32
    %24 = arith.cmpi ne, %23, %c0_i32_12 : i32
    scf.if %24 {
      %c0_13 = arith.constant 0 : index
      %c0_14 = arith.constant 0 : index
      %25 = vector.load %arg8[%c0_13, %c0_14] : memref<16x128xf32, #tpu.memory_space<vmem>>, vector<16x128xf32>
      %c0_15 = arith.constant 0 : index
      %c0_16 = arith.constant 0 : index
      %26 = vector.load %arg6[%c0_15, %c0_16] : memref<1x128xf32, #tpu.memory_space<vmem>>, vector<1x128xf32>
      %27 = vector.broadcast %26 : vector<1x128xf32> to vector<16x128xf32>
      %28 = arith.addf %25, %27 : vector<16x128xf32>
      %c0_17 = arith.constant 0 : index
      %c0_18 = arith.constant 0 : index
      %29 = vector.load %arg7[%c0_17, %c0_18] : memref<16x128xf32, #tpu.memory_space<vmem>>, vector<16x128xf32>
      tpu.vector_store %arg7[%c0_17, %c0_18], %28 {strides = array<i32>} : memref<16x128xf32, #tpu.memory_space<vmem>>, vector<16x128xf32>,
    } else {
    }
    return
  }
  func.func @transform_0(%arg0: i32, %arg1: i32) -> (i32, i32) {
    %c0_i32 = arith.constant 0 : i32
    %c0_i32_0 = arith.constant 0 : i32
    return %arg0, %c0_i32 : i32, i32
  }
  func.func @transform_1(%arg0: i32, %arg1: i32) -> (i32, i32) {
    %c0_i32 = arith.constant 0 : i32
    %c0_i32_0 = arith.constant 0 : i32
    %c0_i32_1 = arith.constant 0 : i32
    return %c0_i32, %c0_i32_0 : i32, i32
  }
  func.func @transform_2(%arg0: i32, %arg1: i32) -> (i32, i32) {
    %c0_i32 = arith.constant 0 : i32
    %c0_i32_0 = arith.constant 0 : i32
    %c0_i32_1 = arith.constant 0 : i32
    return %c0_i32, %c0_i32_0 : i32, i32
  }
  func.func @transform_3(%arg0: i32, %arg1: i32) -> (i32, i32) {
    %c0_i32 = arith.constant 0 : i32
    %c0_i32_0 = arith.constant 0 : i32
    %c0_i32_1 = arith.constant 0 : i32
    return %c0_i32, %c0_i32_0 : i32, i32
  }
  func.func @transform_4(%arg0: i32, %arg1: i32) -> (i32, i32) {
    %c0_i32 = arith.constant 0 : i32
    %c0_i32_0 = arith.constant 0 : i32
    %c0_i32_1 = arith.constant 0 : i32
    return %c0_i32, %c0_i32_0 : i32, i32
  }
  func.func @transform_5(%arg0: i32, %arg1: i32) -> (i32, i32) {
    %c0_i32 = arith.constant 0 : i32
    %c0_i32_0 = arith.constant 0 : i32
    return %arg0, %c0_i32 : i32, i32
  }
}

</mosaic_0001>

<bundles_post_ra>
// kernel: tpu_custom_call.1
= control target key start
LH: loop header
LB: loop body
LE: loop exit
PB: predicated region body
PF: predicated region fallthrough
CT: control target
= control target key end

     0   :  { %10 = vsyncpa [#allocation4], 0  ;;  %s1173_s0 = inlined_call_operand.hbm [shape: bf16[16,128], index: 0, kind: input, shape index: {}]   ;;  %s1174_s1 = inlined_call_operand.hbm [shape: bf16[128,512], index: 1, kind: input, shape index: {}]   ;;  %s1175_s2 = inlined_call_operand.vmem [shape: f32[1,512], index: 2, kind: input, shape index: {}]   ;;  %s1176_s3 = inlined_call_operand.hbm [shape: bf16[512,128], index: 3, kind: input, shape index: {}]   ;;  %s1177_s4 = inlined_call_operand.vmem [shape: f32[1,128], index: 4, kind: input, shape index: {}]   ;;  %s1178_s5 = inlined_call_operand.hbm [shape: f32[16,128], index: 5, kind: output, shape index: {}]  }
   0x1   :  { %11 = vsyncpa [#allocation7], 0 }
   0x2   :  { %12 = vsyncpa [#allocation5], 0  ;;  %s1078_s18 = smov [#allocation6]   ;;  %s984_s22 = scalar_lea.hbm %s1174_s1, 4096 }
   0x3   :  { %s30_s19 = sshll.u32 %s1078_s18, 4  ;;  %p985_p0 = scmp.ne.s32.totalorder %s1174_s1, %s984_s22  ;;  %s31_s19 = int_to_ptr.vmem [resolvable:$true] %s30_s19 }
   0x4   :  { %p988_p1 = scmp.lt.u32.totalorder %s984_s22, %s1174_s1 }
   0x6   :  { %p990_p2 = pnand %p988_p1, %p985_p0 }
   0x8   :  { %993 = shalt.err (!%p990_p2)
}
   0x9   :  { %s994_s27 = scalar_lea.vmem %s31_s19, 4096  ;;  %p999_p4 = scmp.lt.s32.totalorder %s31_s19, %s31_s19 }
   0xa   :  { %p995_p3 = scmp.ne.s32.totalorder %s31_s19, %s994_s27  ;;  %p1000_p5 = scmp.lt.s32.totalorder %s994_s27, %s994_s27 }
   0xc   :  { %p1001_p6 = por %p1000_p5, %p999_p4 }
   0xe   :  { %p1002_p7 = pnand %p1001_p6, %p995_p3 }
  0x10   :  { %1005 = shalt.err (!%p1002_p7)
}
  0x11   :  { %s1079_s28 = smov 256   ;;  %s1080_s29 = smov 16  }
  0x12   :  { %36 = dma.hbm_to_vmem [thread:$0]  %s1174_s1, 4096, %s31_s19, [#allocation7], %s1079_s28, %s1079_s28, %s1080_s29  }
  0x13   :  { %s1081_s7 = smov [#allocation3]   ;;  %s1006_s11 = scalar_lea.hbm %s1173_s0, 128 }
  0x14   :  { %s18_s8 = sshll.u32 %s1081_s7, 4  ;;  %p1007_p8 = scmp.ne.s32.totalorder %s1173_s0, %s1006_s11  ;;  %s19_s8 = int_to_ptr.vmem [resolvable:$true] %s18_s8 }
  0x15   :  { %p1010_p9 = scmp.lt.u32.totalorder %s1006_s11, %s1173_s0 }
  0x17   :  { %p1012_p10 = pnand %p1010_p9, %p1007_p8 }
  0x19   :  { %1015 = shalt.err (!%p1012_p10)
}
  0x1a   :  { %s1016_s16 = scalar_lea.vmem %s19_s8, 128  ;;  %p1021_p12 = scmp.lt.s32.totalorder %s19_s8, %s19_s8 }
  0x1b   :  { %p1017_p11 = scmp.ne.s32.totalorder %s19_s8, %s1016_s16  ;;  %p1022_p13 = scmp.lt.s32.totalorder %s1016_s16, %s1016_s16 }
  0x1d   :  { %p1023_p0 = por %p1022_p13, %p1021_p12 }
  0x1f   :  { %p1024_p1 = pnand %p1023_p0, %p1017_p11 }
  0x21   :  { %1027 = shalt.err (!%p1024_p1)
}
  0x22   :  { %s1082_s1 = smov 64   ;;  %s1083_s17 = smov 4  }
  0x23   :  { %24 = dma.hbm_to_vmem [thread:$0]  %s1173_s0, 128, %s19_s8, [#allocation4], %s1082_s1, %s1082_s1, %s1083_s17  }
  0x24   :  { %s1084_s20 = smov [#allocation8]   ;;  %s1028_s24 = scalar_lea.hbm %s1176_s3, 4096 }
  0x25   :  { %s44_s21 = sshll.u32 %s1084_s20, 4  ;;  %p1029_p2 = scmp.ne.s32.totalorder %s1176_s3, %s1028_s24  ;;  %s45_s21 = int_to_ptr.vmem [resolvable:$true] %s44_s21 }
  0x26   :  { %p1032_p3 = scmp.lt.u32.totalorder %s1028_s24, %s1176_s3 }
  0x28   :  { %p1034_p4 = pnand %p1032_p3, %p1029_p2 }
  0x2a   :  { %1037 = shalt.err (!%p1034_p4)
}
  0x2b   :  { %s1038_s29 = scalar_lea.vmem %s45_s21, 4096  ;;  %p1043_p6 = scmp.lt.s32.totalorder %s45_s21, %s45_s21 }
  0x2c   :  { %p1039_p5 = scmp.ne.s32.totalorder %s45_s21, %s1038_s29  ;;  %p1044_p7 = scmp.lt.s32.totalorder %s1038_s29, %s1038_s29 }
  0x2e   :  { %p1045_p8 = por %p1044_p7, %p1043_p6 }
  0x30   :  { %p1046_p9 = pnand %p1045_p8, %p1039_p5 }
  0x32   :  { %1049 = shalt.err (!%p1046_p9)
}
  0x33   :  { %50 = dma.hbm_to_vmem [thread:$0]  %s1176_s3, 4096, %s45_s21, [#allocation7], %s1082_s1, %s1082_s1, %s1083_s17  }
  0x34   :  { %1072 = dma.done.wait [#allocation4], 128  }
  0x35   :  { %1073 = vsyncadd [#allocation4], 4294967168 }
  0x36   :  { %1074 = dma.done.wait [#allocation7], 8192  }
  0x37   :  { %1075 = vsyncadd [#allocation7], 4294959104  ;;  %v1085_v0 = vmov 0   ;;  %v903_v1 = vld [vmem:[#allocation6 + $0x4] ss:$16 sps:$4 sm:$0xff]   ;;  %v951_v34 = vld [vmem:[#allocation3] sm:$0xff]  }
  0x38   :  { %397 = vmatprep.mubr.bf16.mxu0 %v1085_v0  ;;  %440 = vmatprep.mubr.bf16.mxu1 %v1085_v0  ;;  %v905_v2 = vld [vmem:[#allocation6 + $0xc] ss:$16 sps:$4 sm:$0xff]   ;;  %v907_v3 = vld [vmem:[#allocation6] ss:$16 sps:$4 sm:$0xff]   ;;  %v908_v4 = vld [vmem:[#allocation6 + $0x8] ss:$16 sps:$4 sm:$0xff]  }
  0x39   :  { %365 = vmatprep.subr.bf16.mxu0 %v903_v1  ;;  %408 = vmatprep.subr.bf16.mxu1 %v905_v2  ;;  %v909_v5 = vld [vmem:[#allocation6 + $0x24] ss:$16 sps:$4 sm:$0xff]   ;;  %v911_v6 = vld [vmem:[#allocation6 + $0x2c] ss:$16 sps:$4 sm:$0xff]   ;;  %v913_v7 = vld [vmem:[#allocation6 + $0x20] ss:$16 sps:$4 sm:$0xff]   ;;  %v179_v2 = vlaneseq }
  0x3a   :  { %366 = vmatpush1.bf16.msra.mxu0 %v907_v3  ;;  %409 = vmatpush1.bf16.msra.mxu1 %v908_v4  ;;  %v914_v8 = vld [vmem:[#allocation6 + $0x28] ss:$16 sps:$4 sm:$0xff]   ;;  %v915_v9 = vld [vmem:[#allocation6 + $0x44] ss:$16 sps:$4 sm:$0xff]   ;;  %v917_v10 = vld [vmem:[#allocation6 + $0x4c] ss:$16 sps:$4 sm:$0xff]  }
  0x3b   :  { %367 = vmatprep.subr.bf16.mxu0 %v909_v5  ;;  %410 = vmatprep.subr.bf16.mxu1 %v911_v6  ;;  %v919_v11 = vld [vmem:[#allocation6 + $0x40] ss:$16 sps:$4 sm:$0xff]   ;;  %v920_v12 = vld [vmem:[#allocation6 + $0x48] ss:$16 sps:$4 sm:$0xff]   ;;  %v921_v13 = vld [vmem:[#allocation6 + $0x64] ss:$16 sps:$4 sm:$0xff]  }
  0x3c   :  { %v923_v14 = vld [vmem:[#allocation6 + $0x6c] ss:$16 sps:$4 sm:$0xff]   ;;  %v925_v15 = vld [vmem:[#allocation6 + $0x60] ss:$16 sps:$4 sm:$0xff]   ;;  %v926_v16 = vld [vmem:[#allocation6 + $0x68] ss:$16 sps:$4 sm:$0xff]  }
  0x3d   :  { %v927_v17 = vld [vmem:[#allocation6 + $0x84] ss:$16 sps:$4 sm:$0xff]   ;;  %v929_v18 = vld [vmem:[#allocation6 + $0x8c] ss:$16 sps:$4 sm:$0xff]   ;;  %v931_v19 = vld [vmem:[#allocation6 + $0x80] ss:$16 sps:$4 sm:$0xff]  }
  0x3e   :  { %368 = vmatpush1.bf16.msra.mxu0 %v913_v7  ;;  %411 = vmatpush1.bf16.msra.mxu1 %v914_v8  ;;  %v932_v20 = vld [vmem:[#allocation6 + $0x88] ss:$16 sps:$4 sm:$0xff]   ;;  %v933_v21 = vld [vmem:[#allocation6 + $0xa4] ss:$16 sps:$4 sm:$0xff]   ;;  %v935_v22 = vld [vmem:[#allocation6 + $0xac] ss:$16 sps:$4 sm:$0xff]  }
  0x3f   :  { %369 = vmatprep.subr.bf16.mxu0 %v915_v9  ;;  %412 = vmatprep.subr.bf16.mxu1 %v917_v10  ;;  %v937_v23 = vld [vmem:[#allocation6 + $0xa0] ss:$16 sps:$4 sm:$0xff]   ;;  %v938_v24 = vld [vmem:[#allocation6 + $0xa8] ss:$16 sps:$4 sm:$0xff]   ;;  %v939_v25 = vld [vmem:[#allocation6 + $0xc4] ss:$16 sps:$4 sm:$0xff]  }
  0x40   :  { %v941_v26 = vld [vmem:[#allocation6 + $0xcc] ss:$16 sps:$4 sm:$0xff]   ;;  %v943_v27 = vld [vmem:[#allocation6 + $0xc0] ss:$16 sps:$4 sm:$0xff]   ;;  %v944_v28 = vld [vmem:[#allocation6 + $0xc8] ss:$16 sps:$4 sm:$0xff]  }
  0x41   :  { %v945_v29 = vld [vmem:[#allocation6 + $0xe4] ss:$16 sps:$4 sm:$0xff]   ;;  %v947_v30 = vld [vmem:[#allocation6 + $0xec] ss:$16 sps:$4 sm:$0xff]   ;;  %v949_v31 = vld [vmem:[#allocation6 + $0xe0] ss:$16 sps:$4 sm:$0xff]  }
  0x42   :  { %370 = vmatpush1.bf16.msra.mxu0 %v919_v11  ;;  %413 = vmatpush1.bf16.msra.mxu1 %v920_v12  ;;  %v950_v32 = vld [vmem:[#allocation6 + $0xe8] ss:$16 sps:$4 sm:$0xff]   ;;  %v952_v33 = vld [vmem:[#allocation8 + $0x40] sm:$0xff]   ;;  %v960_v42 = vld [vmem:[#allocation8 + $0x50] sm:$0xff]   ;;  %v180_v3 = vshrl.u32 %v179_v2, 7  ;;  %s1086_s8 = smov [#allocation9]  }
  0x43   :  { %371 = vmatprep.subr.bf16.mxu0 %v921_v13  ;;  %414 = vmatprep.subr.bf16.mxu1 %v923_v14  ;;  %v953_v35 = vld [vmem:[#allocation8 + $0xc0] sm:$0xff]   ;;  %v956_v38 = vld [vmem:[#allocation8 + $0x48] sm:$0xff]   ;;  %v961_v43 = vld [vmem:[#allocation8 + $0xd0] sm:$0xff]   ;;  %s764_s9 = sshll.u32 %s1086_s8, 4  ;;  %s765_s9 = int_to_ptr.vmem [resolvable:$true] %s764_s9 }
  0x44   :  { %v954_v36 = vld [vmem:[#allocation8] sm:$0xff]   ;;  %v957_v39 = vld [vmem:[#allocation8 + $0xc8] sm:$0xff]   ;;  %v962_v44 = vld [vmem:[#allocation8 + $0x10] sm:$0xff]   ;;  %v181_v4 = vsub.s32 0, %v180_v3  ;;  %v189_v5 = vsub.s32 2, %v180_v3  ;;  %v185_v7 = vsub.s32 1, %v180_v3  ;;  %p1055_p11 = scmp.lt.s32.totalorder %s765_s9, %s765_s9 }
  0x45   :  { %v955_v37 = vld [vmem:[#allocation8 + $0x80] sm:$0xff]   ;;  %v958_v40 = vld [vmem:[#allocation8 + $0x8] sm:$0xff]   ;;  %v963_v45 = vld [vmem:[#allocation8 + $0x90] sm:$0xff]   ;;  %v193_v8 = vsub.s32 3, %v180_v3  ;;  %s1050_s10 = scalar_lea.vmem %s765_s9, 256 }
  0x46   :  { %372 = vmatpush1.bf16.msra.mxu0 %v925_v15  ;;  %415 = vmatpush1.bf16.msra.mxu1 %v926_v16  ;;  %v959_v41 = vld [vmem:[#allocation8 + $0x88] sm:$0xff]   ;;  %v964_v46 = vld [vmem:[#allocation8 + $0x58] sm:$0xff]   ;;  %v968_v50 = vld [vmem:[#allocation8 + $0x60] sm:$0xff]   ;;  %p1051_p10 = scmp.ne.s32.totalorder %s765_s9, %s1050_s10  ;;  %p1056_p12 = scmp.lt.s32.totalorder %s1050_s10, %s1050_s10 }
  0x47   :  { %373 = vmatprep.subr.bf16.mxu0 %v927_v17  ;;  %416 = vmatprep.subr.bf16.mxu1 %v929_v18  ;;  %v965_v47 = vld [vmem:[#allocation8 + $0xd8] sm:$0xff]   ;;  %v969_v51 = vld [vmem:[#allocation8 + $0xe0] sm:$0xff]   ;;  %v972_v54 = vld [vmem:[#allocation8 + $0x68] sm:$0xff]  }
  0x48   :  { %v966_v48 = vld [vmem:[#allocation8 + $0x18] sm:$0xff]   ;;  %v970_v52 = vld [vmem:[#allocation8 + $0x20] sm:$0xff]   ;;  %v973_v55 = vld [vmem:[#allocation8 + $0xe8] sm:$0xff]   ;;  %p1057_p13 = por %p1056_p12, %p1055_p11 }
  0x49   :  { %v967_v49 = vld [vmem:[#allocation8 + $0x98] sm:$0xff]   ;;  %v971_v53 = vld [vmem:[#allocation8 + $0xa0] sm:$0xff]   ;;  %v974_v56 = vld [vmem:[#allocation8 + $0x28] sm:$0xff]  }
  0x4a   :  { %374 = vmatpush1.bf16.msra.mxu0 %v931_v19  ;;  %417 = vmatpush1.bf16.msra.mxu1 %v932_v20  ;;  %v975_v57 = vld [vmem:[#allocation8 + $0xa8] sm:$0xff]   ;;  %v976_v58 = vld [vmem:[#allocation8 + $0x70] sm:$0xff]   ;;  %v980_v62 = vld [vmem:[#allocation8 + $0x78] sm:$0xff]   ;;  %p1058_p0 = pnand %p1057_p13, %p1051_p10 }
  0x4b   :  { %375 = vmatprep.subr.bf16.mxu0 %v933_v21  ;;  %418 = vmatprep.subr.bf16.mxu1 %v935_v22  ;;  %v977_v59 = vld [vmem:[#allocation8 + $0xf0] sm:$0xff]   ;;  %v981_v63 = vld [vmem:[#allocation8 + $0xf8] sm:$0xff]  }
  0x4c   :  { %v978_v60 = vld [vmem:[#allocation8 + $0x30] sm:$0xff]   ;;  %v982_v0 = vld [vmem:[#allocation8 + $0x38] sm:$0xff]  }
  0x4d   :  { %v979_v61 = vld [vmem:[#allocation8 + $0xb0] sm:$0xff]   ;;  %v983_v1 = vld [vmem:[#allocation8 + $0xb8] sm:$0xff]  }
  0x4e   :  { %376 = vmatpush1.bf16.msra.mxu0 %v937_v23  ;;  %419 = vmatpush1.bf16.msra.mxu1 %v938_v24  ;;  %v107_v6 = vld [vmem:[%s1175_s2] sm:$0xf] }
  0x4f   :  { %377 = vmatprep.subr.bf16.mxu0 %v939_v25  ;;  %420 = vmatprep.subr.bf16.mxu1 %v941_v26  ;;  %v182_v9 = vrot.slane %v107_v6, %v181_v4  ;;  %v190_v10 = vrot.slane %v107_v6, %v189_v5  ;;  %v186_v11 = vrot.slane %v107_v6, %v185_v7 }
  0x50   :  { %v194_v12 = vrot.slane %v107_v6, %v193_v8 }
  0x52   :  { %378 = vmatpush1.bf16.msra.mxu0 %v943_v27  ;;  %421 = vmatpush1.bf16.msra.mxu1 %v944_v28 }
  0x53   :  { %379 = vmatprep.subr.bf16.mxu0 %v945_v29  ;;  %422 = vmatprep.subr.bf16.mxu1 %v947_v30 }
  0x56   :  { %380 = vmatpush1.bf16.msra.mxu0 %v949_v31  ;;  %423 = vmatpush1.bf16.msra.mxu1 %v950_v32 }
  0x57   :  { %848 = vmatprep.subr.bf16.mxu0 %v952_v33  ;;  %870 = vmatprep.subr.bf16.mxu1 %v953_v35 }
  0x59   :  { %398 = vmatmul.mubr.bf16.vlgmr.msra.gmra.mrb[0].mxu0 %v951_v34  ;;  %441 = vmatmul.mubr.bf16.vlgmr.msra.gmra.mrb[0].mxu1 %v951_v34 }
  0x5a   :  { %849 = vmatpush3.bf16.msra.mxu0 %v954_v36  ;;  %871 = vmatpush3.bf16.msra.mxu1 %v955_v37 }
  0x5b   :  { %850 = vmatprep.subr.bf16.mxu0 %v956_v38  ;;  %872 = vmatprep.subr.bf16.mxu1 %v957_v39 }
  0x5e   :  { %851 = vmatpush3.bf16.msra.mxu0 %v958_v40  ;;  %873 = vmatpush3.bf16.msra.mxu1 %v959_v41 }
  0x5f   :  { %852 = vmatprep.subr.bf16.mxu0 %v960_v42  ;;  %874 = vmatprep.subr.bf16.mxu1 %v961_v43 }
  0x62   :  { %853 = vmatpush3.bf16.msra.mxu0 %v962_v44  ;;  %875 = vmatpush3.bf16.msra.mxu1 %v963_v45 }
  0x63   :  { %854 = vmatprep.subr.bf16.mxu0 %v964_v46  ;;  %876 = vmatprep.subr.bf16.mxu1 %v965_v47 }
  0x66   :  { %855 = vmatpush3.bf16.msra.mxu0 %v966_v48  ;;  %877 = vmatpush3.bf16.msra.mxu1 %v967_v49  ;;  %v847_v49 = vld [vmem:[%s1177_s4] ss:$0 sm:$0xff] }
  0x67   :  { %856 = vmatprep.subr.bf16.mxu0 %v968_v50  ;;  %878 = vmatprep.subr.bf16.mxu1 %v969_v51 }
  0x6a   :  { %857 = vmatpush3.bf16.msra.mxu0 %v970_v52  ;;  %879 = vmatpush3.bf16.msra.mxu1 %v971_v53 }
  0x6b   :  { %858 = vmatprep.subr.bf16.mxu0 %v972_v54  ;;  %880 = vmatprep.subr.bf16.mxu1 %v973_v55 }
  0x6e   :  { %859 = vmatpush3.bf16.msra.mxu0 %v974_v56  ;;  %881 = vmatpush3.bf16.msra.mxu1 %v975_v57 }
  0x6f   :  { %860 = vmatprep.subr.bf16.mxu0 %v976_v58  ;;  %882 = vmatprep.subr.bf16.mxu1 %v977_v59 }
  0x72   :  { %861 = vmatpush3.bf16.msra.mxu0 %v978_v60  ;;  %883 = vmatpush3.bf16.msra.mxu1 %v979_v61 }
  0x73   :  { %862 = vmatprep.subr.bf16.mxu0 %v980_v62  ;;  %884 = vmatprep.subr.bf16.mxu1 %v981_v63 }
  0x76   :  { %863 = vmatpush3.bf16.msra.mxu0 %v982_v0  ;;  %885 = vmatpush3.bf16.msra.mxu1 %v983_v1 }
 0x12c   :  { %v399_v13 = vpop.f32.mrb[0].mxu0  ;;  %v442_v14 = vpop.f32.mrb[0].mxu1 }
 0x12d   :  { %v400_v15 = vadd.f32 %v399_v13, %v182_v9  ;;  %v443_v16 = vadd.f32 %v442_v14, %v190_v10  ;;  %v401_v17 = vpop.f32.mrb[1].mxu0  ;;  %v444_v18 = vpop.f32.mrb[1].mxu1 }
 0x12e   :  { %v402_v19 = vadd.f32 %v401_v17, %v186_v11  ;;  %v445_v20 = vadd.f32 %v444_v18, %v194_v12  ;;  %v403_v21 = vpop.f32.mrb[2].mxu0  ;;  %v446_v22 = vpop.f32.mrb[2].mxu1 }
 0x12f   :  { %v404_v23 = vadd.f32 %v403_v21, %v182_v9  ;;  %v447_v24 = vadd.f32 %v446_v22, %v190_v10  ;;  %v405_v25 = vpop.f32.mrb[3].mxu0  ;;  %v448_v26 = vpop.f32.mrb[3].mxu1  ;;  %v451_v29 = vmax.f32 %v400_v15, 0.0  ;;  %v453_v30 = vmax.f32 %v443_v16, 0.0 }
 0x130   :  { %v406_v27 = vadd.f32 %v405_v25, %v186_v11  ;;  %v449_v28 = vadd.f32 %v448_v26, %v194_v12  ;;  %v452_v33 = vmax.f32 %v402_v19, 0.0  ;;  %v454_v34 = vmax.f32 %v445_v20, 0.0 }
 0x131   :  { %v455_v31 = vmax.f32 %v404_v23, 0.0  ;;  %v457_v32 = vmax.f32 %v447_v24, 0.0 }
 0x132   :  { %v456_v35 = vmax.f32 %v406_v27, 0.0  ;;  %v458_v36 = vmax.f32 %v449_v28, 0.0 }
 0x133   :  { %v461_v37 = vpack.c.bf16 %v455_v31, %v451_v29  ;;  %v463_v38 = vpack.c.bf16 %v457_v32, %v453_v30 }
 0x134   :  { %v462_v39 = vpack.c.bf16 %v456_v35, %v452_v33  ;;  %v464_v40 = vpack.c.bf16 %v458_v36, %v454_v34 }
 0x136   :  { %689 = vmatprep.mubr.bf16.mxu0 %v462_v39  ;;  %730 = vmatprep.mubr.bf16.mxu1 %v464_v40 }
 0x137   :  { %690 = vmatmul.mubr.bf16.vlgmr.msra.gmra.mrb[4].mxu0 %v461_v37  ;;  %731 = vmatmul.mubr.bf16.vlgmr.msra.gmra.mrb[4].mxu1 %v463_v38 }
 0x20a   :  { %v864_v41 = vpop.f32.mrb[4].mxu0  ;;  %v886_v42 = vpop.f32.mrb[4].mxu1 }
 0x20b   :  { %v865_v43 = vpop.f32.mrb[5].mxu0  ;;  %v887_v44 = vpop.f32.mrb[5].mxu1 }
 0x20c   :  { %v866_v45 = vadd.f32 %v865_v43, %v864_v41  ;;  %v888_v46 = vadd.f32 %v887_v44, %v886_v42  ;;  %v867_v47 = vpop.f32.mrb[6].mxu0  ;;  %v889_v48 = vpop.f32.mrb[6].mxu1 }
 0x20d   :  { %v868_v50 = vpop.f32.mrb[7].mxu0  ;;  %v890_v51 = vpop.f32.mrb[7].mxu1 }
 0x20e   :  { %v733_v52 = vadd.f32 %v888_v46, %v866_v45  ;;  %v869_v53 = vadd.f32 %v868_v50, %v867_v47  ;;  %v891_v54 = vadd.f32 %v890_v51, %v889_v48 }
 0x210   :  { %v755_v55 = vadd.f32 %v847_v49, %v733_v52  ;;  %v736_v56 = vadd.f32 %v891_v54, %v869_v53 }
 0x212   :  { %757 = vst [vmem:[#allocation9] sm:$0xff] %v755_v55  ;;  %v756_v57 = vadd.f32 %v847_v49, %v736_v56 }
 0x214   :  { %758 = vst [vmem:[#allocation9 + $0x8] sm:$0xff] %v756_v57 }
 0x215   :  { %1061 = shalt.err (!%p1058_p0)
}
 0x216   :  { %s1062_s12 = scalar_lea.hbm %s1178_s5, 256 }
 0x217   :  { %p1063_p1 = scmp.ne.s32.totalorder %s1178_s5, %s1062_s12  ;;  %p1066_p2 = scmp.lt.u32.totalorder %s1062_s12, %s1178_s5 }
 0x219   :  { %p1068_p3 = pnand %p1066_p2, %p1063_p1 }
 0x21b   :  { %1071 = shalt.err (!%p1068_p3)
}
 0x21c   :  { %s1087_s1 = smov 128   ;;  %s1088_s17 = smov 8  }
 0x21d   :  { %770 = dma.vmem_to_hbm [thread:$0]  %s765_s9, 256, %s1178_s5, [#allocation5], %s1087_s1, %s1087_s1, %s1088_s17  }
 0x21e   :  { %1076 = dma.done.wait [#allocation5], 256  }
 0x21f   :  { %1077 = vsyncadd [#allocation5], 4294967040 }
 0x220   :  { %774 = vsyncpa [#allocation4], 1 }
 0x221   :  { %775 = vsyncpa [#allocation7], 1 }
 0x222   :  { %776 = vsyncpa [#allocation5], 1 }

</bundles_post_ra>
